<compile_context>
chip_gen: v7x
topology: tpu7x:2x2x1
jax: 0.10.0
libtpu: 0.0.40
codegen_flags: <defaults>
</compile_context>

<pallas_src>
import functools

import jax
import jax.numpy as jnp
from jax.experimental import pallas as pl
from jax.experimental.pallas import tpu as pltpu

# PyTorch SELU constants
_SELU_ALPHA = 1.6732632423543772848170429916717
_SELU_SCALE = 1.0507009873554804934193349852946
_BN_EPS = 1e-5


def _linear_stats_kernel(x_ref, w_ref, b_ref, y_ref, stats_ref, *, m_total):
    """Pass 1: y = x @ w + b for one M-tile + masked, bias-centered BN stats."""
    tm = x_ref.shape[0]
    xw = jnp.dot(x_ref[...], w_ref[...], preferred_element_type=jnp.float32)
    y_ref[...] = (xw + b_ref[...]).astype(y_ref.dtype)

    # Tail-row mask: the last tile may extend past M (no wrapper-side padding).
    # The y store above is masked by the pipeline; the stats must not see the
    # garbage rows.
    row = pl.program_id(0) * tm + jax.lax.broadcasted_iota(jnp.int32, (tm, 1), 0)
    xw_m = jnp.where(row < m_total, xw, 0.0)

    # Bias-centered per-column partial sums (XLU sublane reduce, free under the
    # DMA bottleneck).  Direct row writes -- no concatenate / relayout.
    stats_ref[0, 0:1, :] = jnp.sum(xw_m, axis=0, keepdims=True)
    stats_ref[0, 1:2, :] = jnp.sum(xw_m * xw_m, axis=0, keepdims=True)


def _bn_selu_kernel(y_ref, scale_ref, shift_ref, o_ref):
    """Pass 2 (lane-dense, elementwise): z = y*scale + shift, then SELU."""
    z = y_ref[...].astype(jnp.float32) * scale_ref[0, 0] + shift_ref[0, 0]
    o_ref[...] = (
        _SELU_SCALE * jnp.where(z > 0.0, z, _SELU_ALPHA * (jnp.exp(z) - 1.0))
    ).astype(o_ref.dtype)


def _physical_vmem_bytes():
    try:
        return int(pltpu.get_tpu_info().vmem_capacity_bytes)
    except Exception:
        return 64 << 20  # conservative default: v7x has the smallest VMEM


def mamba_head_forward(x_ssl_feat, w, b, gamma, beta, *, tm=None):
    """Linear(1024->E) + global BatchNorm (batch stats) + SELU.

    x_ssl_feat: (B, T, 1024) f32 or bf16 (bf16 is the recommended production
    path: halves the dominant HBM read; accumulation/stats/BN stay f32).
    w: (1024, E) same dtype family as x; b/gamma/beta: f32 scalars/vectors.
    Output dtype follows x_ssl_feat.dtype.
    """
    B, T, K = x_ssl_feat.shape
    E = w.shape[1]
    M = B * T

    x2d = x_ssl_feat.reshape(M, K)          # no padding: tail tile is partial
    out_dtype = x_ssl_feat.dtype
    itemsize = jnp.dtype(x_ssl_feat.dtype).itemsize
    row_align = max(8, 32 // itemsize)      # bf16 packs 16 rows per sublane grp

    vmem_phys = _physical_vmem_bytes()
    if tm is None:
        # Budget the single-buffered x tile at ~1/8 of physical VMEM:
        #   v5e/v6e (128 MiB): f32 -> 4096 rows, bf16 -> 8192 rows
        #   v7x      (64 MiB): f32 -> 2048 rows, bf16 -> 4096 rows
        tm = (vmem_phys // 8) // (K * itemsize)
        tm = max(512, min(8192, (tm // 512) * 512))
    tm = max(row_align, (tm // row_align) * row_align)
    tm = min(tm, ((M + row_align - 1) // row_align) * row_align)
    n_tiles = pl.cdiv(M, tm)
    # Feed both TensorCores (v7x megacore) when one tile would cover all rows.
    if n_tiles == 1 and M > row_align:
        half = (((M + 1) // 2 + row_align - 1) // row_align) * row_align
        if half < tm:
            tm = half
            n_tiles = pl.cdiv(M, tm)

    b_f32 = jnp.asarray(b, jnp.float32).reshape(1, E)

    # VMEM budget: double-buffered x/y tiles + weight + bias + stats, 30% slack;
    # always >= 32 MiB (v5e scoped default is only 16 MiB), < physical VMEM.
    need = 2 * (tm * K * itemsize + K * E * jnp.dtype(w.dtype).itemsize
                + tm * E * itemsize + 2 * E * 4 + E * 4)
    vmem_limit = max(32 << 20, min(int(need * 1.3), vmem_phys - (8 << 20)))
    compiler_params = pltpu.CompilerParams(
        dimension_semantics=("parallel",),
        vmem_limit_bytes=vmem_limit,
    )

    # ---- Pass 1: Linear (+bias) and per-tile BN partial statistics. --------
    y2d, stats = pl.pallas_call(
        functools.partial(_linear_stats_kernel, m_total=M),
        out_shape=(
            jax.ShapeDtypeStruct((M, E), out_dtype),
            jax.ShapeDtypeStruct((n_tiles, 2, E), jnp.float32),
        ),
        grid_spec=pltpu.PrefetchScalarGridSpec(
            num_scalar_prefetch=0,
            grid=(n_tiles,),
            in_specs=[
                pl.BlockSpec((tm, K), lambda i: (i, 0)),   # activations (streamed)
                pl.BlockSpec((K, E), lambda i: (0, 0)),    # weight (VMEM-resident)
                pl.BlockSpec((1, E), lambda i: (0, 0)),    # bias
            ],
            out_specs=(
                pl.BlockSpec((tm, E), lambda i: (i, 0)),       # y = x @ w + b
                pl.BlockSpec((1, 2, E), lambda i: (i, 0, 0)),  # partial stats
            ),
        ),
        compiler_params=compiler_params,
    )(x2d, w, b_f32)

    # ---- Fold bias-centered partial sums into scalar batch stats (tiny). ---
    # With d = x @ w (per-column sums s, q):  y = d + b, so
    #   sum(y)   = sum(s) + M*sum(b)
    #   sum(y^2) = sum(q + 2*b*s) + M*sum(b^2)
    s = jnp.sum(stats[:, 0, :], axis=0)                       # (E,)
    q = jnp.sum(stats[:, 1, :], axis=0)                       # (E,)
    count = jnp.float32(M * E)
    total_sum = jnp.sum(s) + M * jnp.sum(b_f32)
    total_sq = jnp.sum(q + 2.0 * b_f32[0] * s) + M * jnp.sum(b_f32 * b_f32)
    mean = total_sum / count
    var = jnp.maximum(total_sq / count - mean * mean, 0.0)    # biased var (BN)
    inv_std = jax.lax.rsqrt(var + _BN_EPS)
    scale = jnp.asarray(gamma, jnp.float32) * inv_std
    shift = jnp.asarray(beta, jnp.float32) - mean * scale

    # ---- Pass 2: lane-dense, in-place BN affine + SELU. --------------------
    total = M * E
    lane = next((c for c in (512, 256, 128) if total % c == 0), None)
    if lane is None:
        y_view, rows2, lane = y2d, M, E        # fallback: original (M, E) layout
    else:
        rows2 = total // lane
        y_view = y2d.reshape(rows2, lane)      # contiguous reshape: free
    tr = rows2 if rows2 <= 4096 else 4096      # big blocks; partial tail OK

    out_view = pl.pallas_call(
        _bn_selu_kernel,
        out_shape=jax.ShapeDtypeStruct((rows2, lane), out_dtype),
        grid_spec=pltpu.PrefetchScalarGridSpec(
            num_scalar_prefetch=0,
            grid=(pl.cdiv(rows2, tr),),
            in_specs=[
                pl.BlockSpec((tr, lane), lambda i: (i, 0)),        # y (streamed)
                pl.BlockSpec(memory_space=pltpu.MemorySpace.SMEM),  # scale
                pl.BlockSpec(memory_space=pltpu.MemorySpace.SMEM),  # shift
            ],
            out_specs=pl.BlockSpec((tr, lane), lambda i: (i, 0)),
        ),
        input_output_aliases={0: 0},           # overwrite y in place
        compiler_params=compiler_params,
    )(y_view, scale.reshape(1, 1), shift.reshape(1, 1))

    return out_view.reshape(B, T, E)


def _reference(x, w, b, gamma, beta):
    y = jnp.einsum("btk,ke->bte", x.astype(jnp.float32), w.astype(jnp.float32),
                   precision=jax.lax.Precision.HIGHEST) + b[None, None, :]
    mean = jnp.mean(y)
    var = jnp.mean((y - mean) ** 2)
    y = (y - mean) / jnp.sqrt(var + _BN_EPS) * gamma + beta
    return _SELU_SCALE * jnp.where(y > 0, y, _SELU_ALPHA * (jnp.exp(y) - 1.0))


if __name__ == "__main__":
    # Small shapes consistent with the module: batch=2, seq=8, ssl_dim=1024
    # (fixed by nn.Linear(1024, emb)), emb_size=32.
    B, T, K, E = 2, 8, 1024, 32

    key = jax.random.PRNGKey(0)
    kx, kw, kb = jax.random.split(key, 3)

    x_ssl_feat = jax.random.normal(kx, (B, T, K), dtype=jnp.float32)
    w = jax.random.normal(kw, (K, E), dtype=jnp.float32) * (1.0 / K) ** 0.5
    b = jax.random.normal(kb, (E,), dtype=jnp.float32) * 0.01
    gamma = jnp.float32(1.0)   # BatchNorm2d fresh init
    beta = jnp.float32(0.0)

    ref = _reference(x_ssl_feat, w, b, gamma, beta)

    # f32 path (tolerance covers MXU pass-precision differences vs XLA einsum).
    out = jax.block_until_ready(mamba_head_forward(x_ssl_feat, w, b, gamma, beta))
    assert out.shape == (B, T, E)
    assert jnp.allclose(out, ref, atol=2e-2, rtol=2e-2)

    # bf16 production path (halves the dominant HBM traffic; f32 accumulate).
    out_bf16 = jax.block_until_ready(
        mamba_head_forward(
            x_ssl_feat.astype(jnp.bfloat16), w.astype(jnp.bfloat16),
            b, gamma, beta))
    assert out_bf16.shape == (B, T, E)
    assert jnp.allclose(out_bf16.astype(jnp.float32), ref, atol=1e-1, rtol=1e-1)

    # Non-tile-aligned M exercises the padding-free masked-tail path
    # (M = 18 with tm = 8 -> two full tiles + one partial tile of 2 valid rows).
    T2 = 9
    x2 = jax.random.normal(jax.random.PRNGKey(1), (B, T2, K), dtype=jnp.float32)
    ref2 = _reference(x2, w, b, gamma, beta)
    out2 = jax.block_until_ready(
        mamba_head_forward(x2, w, b, gamma, beta, tm=8))
    assert out2.shape == (B, T2, E)
    assert jnp.allclose(out2, ref2, atol=2e-2, rtol=2e-2)

    print("KERNEL_OK")
</pallas_src>

<mosaic_0001>
module attributes {stable_mosaic.version = 11 : i64} {
  func.func @_linear_stats_kernel(%arg0: i32, %arg1: memref<8x1024xf32, #tpu.memory_space<vmem>>, %arg2: memref<1024x32xf32, #tpu.memory_space<vmem>>, %arg3: memref<1x32xf32, #tpu.memory_space<vmem>>, %arg4: memref<8x32xf32, #tpu.memory_space<vmem>>, %arg5: memref<1x2x32xf32, #tpu.memory_space<vmem>>) attributes {dimension_semantics = [#tpu.dimension_semantics<parallel>], iteration_bounds = array<i64: 2>, scalar_prefetch = 0 : i64, scratch_operands = 0 : i64, tpu.core_type = #tpu.core_type<tc>, window_params = [{transform_indices = @transform_0, window_bounds = array<i64: 8, 1024>}, {pipeline_mode = #tpu.pipeline_mode<synchronous>, transform_indices = @transform_1, window_bounds = array<i64: 1024, 32>}, {pipeline_mode = #tpu.pipeline_mode<synchronous>, transform_indices = @transform_2, window_bounds = array<i64: 1, 32>}, {transform_indices = @transform_3, window_bounds = array<i64: 8, 32>}, {transform_indices = @transform_4, window_bounds = array<i64: 1, 2, 32>}]} {
    %c0 = arith.constant 0 : index
    %c0_0 = arith.constant 0 : index
    %0 = vector.load %arg1[%c0, %c0_0] : memref<8x1024xf32, #tpu.memory_space<vmem>>, vector<8x1024xf32>
    %c0_1 = arith.constant 0 : index
    %c0_2 = arith.constant 0 : index
    %1 = vector.load %arg2[%c0_1, %c0_2] : memref<1024x32xf32, #tpu.memory_space<vmem>>, vector<1024x32xf32>
    %cst = arith.constant dense<0.000000e+00> : vector<8x32xf32>
    %2 = tpu.matmul %0, %1, %cst {dimension_numbers = #tpu.dot_dimension_numbers<[1], [0], [0], [1], [0, 0, 1, 1], [], []>} : vector<8x1024xf32>, vector<1024x32xf32>, vector<8x32xf32> -> vector<8x32xf32>
    %c0_3 = arith.constant 0 : index
    %c0_4 = arith.constant 0 : index
    %3 = vector.load %arg3[%c0_3, %c0_4] : memref<1x32xf32, #tpu.memory_space<vmem>>, vector<1x32xf32>
    %4 = vector.broadcast %3 : vector<1x32xf32> to vector<8x32xf32>
    %5 = arith.addf %2, %4 : vector<8x32xf32>
    %c0_5 = arith.constant 0 : index
    %c0_6 = arith.constant 0 : index
    %6 = vector.load %arg4[%c0_5, %c0_6] : memref<8x32xf32, #tpu.memory_space<vmem>>, vector<8x32xf32>
    tpu.vector_store %arg4[%c0_5, %c0_6], %5 {strides = array<i32>} : memref<8x32xf32, #tpu.memory_space<vmem>>, vector<8x32xf32>,
    %c8_i32 = arith.constant 8 : i32
    %7 = arith.muli %arg0, %c8_i32 : i32
    %8 = tpu.iota {dimensions = array<i32: 0>} : vector<8x1xi32>
    %9 = vector.broadcast %7 : i32 to vector<8x1xi32>
    %10 = arith.addi %9, %8 : vector<8x1xi32>
    %c16_i32 = arith.constant 16 : i32
    %11 = vector.broadcast %c16_i32 : i32 to vector<8x1xi32>
    %12 = arith.cmpi slt, %10, %11 : vector<8x1xi32>
    %cst_7 = arith.constant 0.000000e+00 : f32
    %13 = vector.shape_cast %12 : vector<8x1xi1> to vector<8x1xi1>
    %14 = vector.broadcast %13 : vector<8x1xi1> to vector<8x32xi1>
    %15 = vector.broadcast %cst_7 : f32 to vector<8x32xf32>
    %16 = arith.select %14, %2, %15 : vector<8x32xi1>, vector<8x32xf32>
    %cst_8 = arith.constant dense<0.000000e+00> : vector<32xf32>
    %17 = vector.multi_reduction <add>, %16, %cst_8 [0] : vector<8x32xf32> to vector<32xf32>
    %18 = vector.shape_cast %17 : vector<32xf32> to vector<1x32xf32>
    %c0_9 = arith.constant 0 : index
    %c0_10 = arith.constant 0 : index
    %c0_11 = arith.constant 0 : index
    %19 = vector.load %arg5[%c0_9, %c0_10, %c0_11] : memref<1x2x32xf32, #tpu.memory_space<vmem>>, vector<1x1x32xf32>
    %20 = vector.shape_cast %19 : vector<1x1x32xf32> to vector<1x32xf32>
    %21 = vector.shape_cast %18 : vector<1x32xf32> to vector<1x1x32xf32>
    tpu.vector_store %arg5[%c0_9, %c0_10, %c0_11], %21 {strides = array<i32>} : memref<1x2x32xf32, #tpu.memory_space<vmem>>, vector<1x1x32xf32>,
    %22 = arith.mulf %16, %16 : vector<8x32xf32>
    %cst_12 = arith.constant dense<0.000000e+00> : vector<32xf32>
    %23 = vector.multi_reduction <add>, %22, %cst_12 [0] : vector<8x32xf32> to vector<32xf32>
    %24 = vector.shape_cast %23 : vector<32xf32> to vector<1x32xf32>
    %c0_13 = arith.constant 0 : index
    %c1 = arith.constant 1 : index
    %c0_14 = arith.constant 0 : index
    %25 = vector.load %arg5[%c0_13, %c1, %c0_14] : memref<1x2x32xf32, #tpu.memory_space<vmem>>, vector<1x1x32xf32>
    %26 = vector.shape_cast %25 : vector<1x1x32xf32> to vector<1x32xf32>
    %27 = vector.shape_cast %24 : vector<1x32xf32> to vector<1x1x32xf32>
    tpu.vector_store %arg5[%c0_13, %c1, %c0_14], %27 {strides = array<i32>} : memref<1x2x32xf32, #tpu.memory_space<vmem>>, vector<1x1x32xf32>,
    return
  }
  func.func @transform_0(%arg0: i32) -> (i32, i32) {
    %c0_i32 = arith.constant 0 : i32
    %c0_i32_0 = arith.constant 0 : i32
    return %arg0, %c0_i32 : i32, i32
  }
  func.func @transform_1(%arg0: i32) -> (i32, i32) {
    %c0_i32 = arith.constant 0 : i32
    %c0_i32_0 = arith.constant 0 : i32
    %c0_i32_1 = arith.constant 0 : i32
    return %c0_i32, %c0_i32_0 : i32, i32
  }
  func.func @transform_2(%arg0: i32) -> (i32, i32) {
    %c0_i32 = arith.constant 0 : i32
    %c0_i32_0 = arith.constant 0 : i32
    %c0_i32_1 = arith.constant 0 : i32
    return %c0_i32, %c0_i32_0 : i32, i32
  }
  func.func @transform_3(%arg0: i32) -> (i32, i32) {
    %c0_i32 = arith.constant 0 : i32
    %c0_i32_0 = arith.constant 0 : i32
    return %arg0, %c0_i32 : i32, i32
  }
  func.func @transform_4(%arg0: i32) -> (i32, i32, i32) {
    %c0_i32 = arith.constant 0 : i32
    %c0_i32_0 = arith.constant 0 : i32
    %c0_i32_1 = arith.constant 0 : i32
    return %arg0, %c0_i32, %c0_i32_0 : i32, i32, i32
  }
}

</mosaic_0001>

<bundles_post_ra>
// kernel: tpu_custom_call.1
= control target key start
LH: loop header
LB: loop body
LE: loop exit
PB: predicated region body
PF: predicated region fallthrough
CT: control target
= control target key end

     0   :  { %10 = vsyncpa [#allocation3], 0  ;;  %s1773_s0 = inlined_call_operand.vmem [shape: f32[16,1024], index: 0, kind: input, shape index: {}]   ;;  %s1774_s1 = inlined_call_operand.vmem [shape: f32[1024,32], index: 1, kind: input, shape index: {}]   ;;  %s1775_s2 = inlined_call_operand.vmem [shape: f32[1,32], index: 2, kind: input, shape index: {}]   ;;  %s1776_s3 = inlined_call_operand.hbm [shape: f32[16,32], index: 3, kind: output, shape index: {0}]   ;;  %s1777_s4 = inlined_call_operand.hbm [shape: f32[2,2,32], index: 4, kind: output, shape index: {1}]  }
   0x1   :  { %12 = vsyncpa [#allocation3 + $0x1], 0 }
   0x2   :  { %13 = vsyncpa [#allocation5], 0 }
   0x3   :  { %15 = vsyncpa [#allocation5 + $0x1], 0  ;;  %s1235_s15 = smov 0   ;;  %s1237_s16 = smov 0  }
   0x4   :  { %s1239_s17 = smov 0   ;;  %s1241_s18 = smov 0  }
   0x5 LB: > { %s1256_s19 = sadd.s32 4294967295, %s1206_s18   ;;  %s783_s20 = sadd.s32 4294967294, %s1206_s18   ;;  %s1206_s18 = sphi %s1241_s18, %s1783_s18   ;;  %s1202_s17 = sphi %s1239_s17, %s1782_s17   ;;  %s1198_s16 = sphi %s1237_s16, %s1781_s16   ;;  %s1194_s15 = sphi %s1235_s15, %s1780_s15  }
   0x6   : > { %s1260_s21 = sadd.s32 1, %s1206_s18   ;;  %s96_s22 = sadd.s32 1, %s1202_s17 }
   0x7   : > { %s93_s23 = ssub.s32 %s1206_s18, %s1260_s21  ;;  %p106_p0 = scmp.ne.s32.totalorder %s1202_s17, %s1198_s16 }
   0x8   : > { %p94_p1 = scmp.eq.s32.totalorder %s93_s23, 0  ;;  %p107_p2 = scmp.eq.s32.totalorder %s1256_s19, 1 }
   0x9   : > { %p112_p3 = scmp.ne.s32.totalorder %s1198_s16, %s1194_s15  ;;  %p113_p4 = scmp.eq.s32.totalorder %s783_s20, 1 }
   0xa   : > { %s1271_s24 = scalar_select %p94_p1, %s1202_s17, %s96_s22  }
   0xb   : > { %p1273_p5 = por %p107_p2, %p106_p0  ;;  %p1277_p6 = por %p113_p4, %p112_p3 }
   0xc   : > { %p786_p7 = scmp.ge.s32.totalorder %s1206_s18, 1  ;;  %p171_p8 = scmp.lt.s32.totalorder %s1206_s18, 3 }
   0xe   : > { %p172_p9 = pnand %p786_p7, %p171_p8 }
   0xf   : > { %v231_v0 = vld [vmem:[%s1774_s1 + $0x80] sm:$0xff] (!%p172_p9)  ;;  %v232_v1 = vld [vmem:[%s1774_s1 + $0x88] sm:$0xff] (!%p172_p9)  ;;  %v233_v11 = vld [vmem:[%s1774_s1 + $0x90] sm:$0xff] (!%p172_p9)  ;;  %p202_p10 = scmp.lt.s32.totalorder (!%p172_p9), %s1256_s19, 1  ;;  %s792_s22 = sshll.u32 (!%p172_p9), %s1256_s19, 3  ;;  %vm631_vm1 = vcmask (!%p172_p9), 261120  }
  0x10   : > { %175 = sbr.rel (%p172_p9) target bundleno = 344 (0x158), region = 32  ;;  %v263_v2 = vld [vmem:[%s1774_s1 + $0x180] sm:$0xff] (!%p172_p9)  ;;  %v940_v3 = vpack.c.bf16 (!%p172_p9), %v232_v1, %v231_v0  ;;  %v264_v4 = vld [vmem:[%s1774_s1 + $0x188] sm:$0xff] (!%p172_p9)  ;;  %v234_v13 = vld [vmem:[%s1774_s1 + $0x98] sm:$0xff] (!%p172_p9)  ;;  %s1689_s23 = sand.u32 (!%p172_p9), 1, %s1198_s16  }
  0x11   : > { %v215_v5 = vld [vmem:[%s1774_s1] sm:$0xff] (!%p172_p9)  ;;  %v216_v6 = vld [vmem:[%s1774_s1 + $0x8] sm:$0xff] (!%p172_p9)  ;;  %v972_v7 = vpack.c.bf16 (!%p172_p9), %v264_v4, %v263_v2  ;;  %v265_v14 = vld [vmem:[%s1774_s1 + $0x190] sm:$0xff] (!%p172_p9)  ;;  %v944_v16 = vpack.c.bf16 (!%p172_p9), %v234_v13, %v233_v11  ;;  %s795_s30 = sshll.u32 (!%p172_p9), %s1256_s19, 7  ;;  %s661_s12 = scalar_lea.sflag (!%p172_p9), [#allocation3], %s1689_s23 }
  0x12   : > { %v942_v8 = vpack.c.bf16 (!%p172_p9), %v216_v6, %v215_v5  ;;  %v247_v9 = vld [vmem:[%s1774_s1 + $0x100] sm:$0xff] (!%p172_p9)  ;;  %v248_v10 = vld [vmem:[%s1774_s1 + $0x108] sm:$0xff] (!%p172_p9)  ;;  %941 = vmatprep.subr.bf16.mxu0 (!%p172_p9), %v940_v3  ;;  %v266_v15 = vld [vmem:[%s1774_s1 + $0x198] sm:$0xff] (!%p172_p9)  ;;  %s1699_s11 = scalar_lea.hbm (!%p172_p9), %s1776_s3, %s795_s30 }
  0x13   : > { %v974_v12 = vpack.c.bf16 (!%p172_p9), %v248_v10, %v247_v9  ;;  %973 = vmatprep.subr.bf16.mxu1 (!%p172_p9), %v972_v7  ;;  %v976_v17 = vpack.c.bf16 (!%p172_p9), %v266_v15, %v265_v14  ;;  %v217_v18 = vld [vmem:[%s1774_s1 + $0x10] sm:$0xff] (!%p172_p9)  ;;  %v218_v19 = vld [vmem:[%s1774_s1 + $0x18] sm:$0xff] (!%p172_p9)  ;;  %v235_v23 = vld [vmem:[%s1774_s1 + $0xa0] sm:$0xff] (!%p172_p9) }
  0x14   : > { %943 = vmatpush3.bf16.msra.mxu0 (!%p172_p9), %v942_v8  ;;  %v249_v20 = vld [vmem:[%s1774_s1 + $0x110] sm:$0xff] (!%p172_p9)  ;;  %v946_v21 = vpack.c.bf16 (!%p172_p9), %v218_v19, %v217_v18  ;;  %v250_v22 = vld [vmem:[%s1774_s1 + $0x118] sm:$0xff] (!%p172_p9)  ;;  %v236_v24 = vld [vmem:[%s1774_s1 + $0xa8] sm:$0xff] (!%p172_p9) }
  0x15   : > { %975 = vmatpush3.bf16.msra.mxu1 (!%p172_p9), %v974_v12  ;;  %945 = vmatprep.subr.bf16.mxu0 (!%p172_p9), %v944_v16  ;;  %v978_v25 = vpack.c.bf16 (!%p172_p9), %v250_v22, %v249_v20  ;;  %v948_v26 = vpack.c.bf16 (!%p172_p9), %v236_v24, %v235_v23  ;;  %v267_v27 = vld [vmem:[%s1774_s1 + $0x1a0] sm:$0xff] (!%p172_p9)  ;;  %v268_v28 = vld [vmem:[%s1774_s1 + $0x1a8] sm:$0xff] (!%p172_p9)  ;;  %v237_v35 = vld [vmem:[%s1774_s1 + $0xb0] sm:$0xff] (!%p172_p9) }
  0x16   : > { %977 = vmatprep.subr.bf16.mxu1 (!%p172_p9), %v976_v17  ;;  %v219_v29 = vld [vmem:[%s1774_s1 + $0x20] sm:$0xff] (!%p172_p9)  ;;  %v980_v30 = vpack.c.bf16 (!%p172_p9), %v268_v28, %v267_v27  ;;  %v220_v31 = vld [vmem:[%s1774_s1 + $0x28] sm:$0xff] (!%p172_p9)  ;;  %v238_v36 = vld [vmem:[%s1774_s1 + $0xb8] sm:$0xff] (!%p172_p9) }
  0x17   : > { %v251_v32 = vld [vmem:[%s1774_s1 + $0x120] sm:$0xff]  ;;  %v252_v33 = vld [vmem:[%s1774_s1 + $0x128] sm:$0xff]  ;;  %v950_v34 = vpack.c.bf16 %v220_v31, %v219_v29  ;;  %v269_v37 = vld [vmem:[%s1774_s1 + $0x1b0] sm:$0xff]  ;;  %v952_v39 = vpack.c.bf16 %v238_v36, %v237_v35  ;;  %s1395_s5 = scalar_select %p202_p10, %s1256_s19, 1 }
  0x18   : > { %947 = vmatpush3.bf16.msra.mxu0 %v946_v21  ;;  %v982_v38 = vpack.c.bf16 %v252_v33, %v251_v32  ;;  %v270_v40 = vld [vmem:[%s1774_s1 + $0x1b8] sm:$0xff]  ;;  %v221_v41 = vld [vmem:[%s1774_s1 + $0x30] sm:$0xff]  ;;  %v239_v46 = vld [vmem:[%s1774_s1 + $0xc0] sm:$0xff] }
  0x19   : > { %979 = vmatpush3.bf16.msra.mxu1 %v978_v25  ;;  %949 = vmatprep.subr.bf16.mxu0 %v948_v26  ;;  %v222_v42 = vld [vmem:[%s1774_s1 + $0x38] sm:$0xff]  ;;  %v984_v43 = vpack.c.bf16 %v270_v40, %v269_v37  ;;  %v253_v44 = vld [vmem:[%s1774_s1 + $0x130] sm:$0xff]  ;;  %v240_v47 = vld [vmem:[%s1774_s1 + $0xc8] sm:$0xff]  ;;  %s799_s6 = sshll.u32 %s1395_s5, 6 }
  0x1a   : > { %981 = vmatprep.subr.bf16.mxu1 %v980_v30  ;;  %v254_v45 = vld [vmem:[%s1774_s1 + $0x138] sm:$0xff]  ;;  %v271_v48 = vld [vmem:[%s1774_s1 + $0x1c0] sm:$0xff]  ;;  %v272_v49 = vld [vmem:[%s1774_s1 + $0x1c8] sm:$0xff]  ;;  %v954_v50 = vpack.c.bf16 %v222_v42, %v221_v41  ;;  %v956_v52 = vpack.c.bf16 %v240_v47, %v239_v46  ;;  %s1443_s29 = scalar_lea.vmem %s1773_s0, %s799_s6  ;;  %s1208_s6 = smov [#allocation2]  }
  0x1b   : > { %v986_v51 = vpack.c.bf16 %v254_v45, %v253_v44  ;;  %v223_v53 = vld [vmem:[%s1774_s1 + $0x40] sm:$0xff]  ;;  %v224_v54 = vld [vmem:[%s1774_s1 + $0x48] sm:$0xff]  ;;  %v988_v56 = vpack.c.bf16 %v272_v49, %v271_v48  ;;  %v241_v58 = vld [vmem:[%s1774_s1 + $0xd0] sm:$0xff]  ;;  %s1116_s13 = sshll.u32 %s1208_s6, 4  ;;  %s1117_s13 = int_to_ptr.vmem [resolvable:$false] %s1116_s13 }
  0x1c   : > { %951 = vmatpush3.bf16.msra.mxu0 %v950_v34  ;;  %v255_v55 = vld [vmem:[%s1774_s1 + $0x140] sm:$0xff]  ;;  %v256_v57 = vld [vmem:[%s1774_s1 + $0x148] sm:$0xff]  ;;  %v242_v59 = vld [vmem:[%s1774_s1 + $0xd8] sm:$0xff]  ;;  %v958_v62 = vpack.c.bf16 %v224_v54, %v223_v53  ;;  %s1118_s14 = scalar_lea.vmem %s1117_s13, 256 }
  0x1d   : > { %983 = vmatpush3.bf16.msra.mxu1 %v982_v38  ;;  %953 = vmatprep.subr.bf16.mxu0 %v952_v39  ;;  %v273_v60 = vld [vmem:[%s1774_s1 + $0x1d0] sm:$0xff]  ;;  %v274_v61 = vld [vmem:[%s1774_s1 + $0x1d8] sm:$0xff]  ;;  %v990_v63 = vpack.c.bf16 %v256_v57, %v255_v55  ;;  %v960_v0 = vpack.c.bf16 %v242_v59, %v241_v58  ;;  %v243_v6 = vld [vmem:[%s1774_s1 + $0xe0] sm:$0xff] }
  0x1e   : > { %985 = vmatprep.subr.bf16.mxu1 %v984_v43  ;;  %v225_v1 = vld [vmem:[%s1774_s1 + $0x50] sm:$0xff]  ;;  %v226_v2 = vld [vmem:[%s1774_s1 + $0x58] sm:$0xff]  ;;  %v992_v4 = vpack.c.bf16 %v274_v61, %v273_v60  ;;  %v244_v7 = vld [vmem:[%s1774_s1 + $0xe8] sm:$0xff] }
  0x1f   : > { %v257_v3 = vld [vmem:[%s1774_s1 + $0x150] sm:$0xff]  ;;  %v258_v5 = vld [vmem:[%s1774_s1 + $0x158] sm:$0xff]  ;;  %v275_v8 = vld [vmem:[%s1774_s1 + $0x1e0] sm:$0xff]  ;;  %v962_v10 = vpack.c.bf16 %v226_v2, %v225_v1  ;;  %v964_v14 = vpack.c.bf16 %v244_v7, %v243_v6 }
  0x20   : > { %955 = vmatpush3.bf16.msra.mxu0 %v954_v50  ;;  %v276_v9 = vld [vmem:[%s1774_s1 + $0x1e8] sm:$0xff]  ;;  %v227_v11 = vld [vmem:[%s1774_s1 + $0x60] sm:$0xff]  ;;  %v994_v13 = vpack.c.bf16 %v258_v5, %v257_v3  ;;  %v210_v17 = vld [vmem:[%s1443_s29 + $0x18] sm:$0xff] }
  0x21   : > { %987 = vmatpush3.bf16.msra.mxu1 %v986_v51  ;;  %957 = vmatprep.subr.bf16.mxu0 %v956_v52  ;;  %v228_v12 = vld [vmem:[%s1774_s1 + $0x68] sm:$0xff]  ;;  %v259_v15 = vld [vmem:[%s1774_s1 + $0x160] sm:$0xff]  ;;  %v996_v18 = vpack.c.bf16 %v276_v9, %v275_v8  ;;  %v245_v20 = vld [vmem:[%s1774_s1 + $0xf0] sm:$0xff] }
  0x22   : > { %989 = vmatprep.subr.bf16.mxu1 %v988_v56  ;;  %v208_v16 = vld [vmem:[%s1443_s29 + $0x8] sm:$0xff]  ;;  %v246_v21 = vld [vmem:[%s1774_s1 + $0xf8] sm:$0xff]  ;;  %v277_v22 = vld [vmem:[%s1774_s1 + $0x1f0] sm:$0xff]  ;;  %477 = vmatprep.mubr.f32.mxu1 %v210_v17  ;;  %v966_v24 = vpack.c.bf16 %v228_v12, %v227_v11 }
  0x23   : > { %v260_v19 = vld [vmem:[%s1774_s1 + $0x168] sm:$0xff]  ;;  %407 = vmatprep.mubr.f32.mxu0 %v208_v16  ;;  %v278_v23 = vld [vmem:[%s1774_s1 + $0x1f8] sm:$0xff]  ;;  %v968_v26 = vpack.c.bf16 %v246_v21, %v245_v20  ;;  %v229_v27 = vld [vmem:[%s1774_s1 + $0x70] sm:$0xff] }
  0x24   : > { %959 = vmatpush3.bf16.msra.mxu0 %v958_v62  ;;  %v998_v25 = vpack.c.bf16 %v260_v19, %v259_v15  ;;  %v230_v28 = vld [vmem:[%s1774_s1 + $0x78] sm:$0xff]  ;;  %v261_v29 = vld [vmem:[%s1774_s1 + $0x170] sm:$0xff]  ;;  %v1000_v30 = vpack.c.bf16 %v278_v23, %v277_v22  ;;  %v295_v32 = vld [vmem:[%s1774_s1 + $0x280] sm:$0xff] }
  0x25   : > { %991 = vmatpush3.bf16.msra.mxu1 %v990_v63  ;;  %961 = vmatprep.subr.bf16.mxu0 %v960_v0  ;;  %v262_v31 = vld [vmem:[%s1774_s1 + $0x178] sm:$0xff]  ;;  %v296_v33 = vld [vmem:[%s1774_s1 + $0x288] sm:$0xff]  ;;  %v327_v34 = vld [vmem:[%s1774_s1 + $0x380] sm:$0xff]  ;;  %v970_v36 = vpack.c.bf16 %v230_v28, %v229_v27 }
  0x26   : > { %993 = vmatprep.subr.bf16.mxu1 %v992_v4  ;;  %v328_v35 = vld [vmem:[%s1774_s1 + $0x388] sm:$0xff]  ;;  %v1002_v37 = vpack.c.bf16 %v262_v31, %v261_v29  ;;  %v1004_v38 = vpack.c.bf16 %v296_v33, %v295_v32  ;;  %v279_v39 = vld [vmem:[%s1774_s1 + $0x200] sm:$0xff]  ;;  %v297_v44 = vld [vmem:[%s1774_s1 + $0x290] sm:$0xff] }
  0x27   : > { %v280_v40 = vld [vmem:[%s1774_s1 + $0x208] sm:$0xff]  ;;  %v311_v41 = vld [vmem:[%s1774_s1 + $0x300] sm:$0xff]  ;;  %v1036_v42 = vpack.c.bf16 %v328_v35, %v327_v34  ;;  %v298_v45 = vld [vmem:[%s1774_s1 + $0x298] sm:$0xff] }
  0x28   : > { %963 = vmatpush3.bf16.msra.mxu0 %v962_v10  ;;  %v312_v43 = vld [vmem:[%s1774_s1 + $0x308] sm:$0xff]  ;;  %v329_v46 = vld [vmem:[%s1774_s1 + $0x390] sm:$0xff]  ;;  %v330_v47 = vld [vmem:[%s1774_s1 + $0x398] sm:$0xff]  ;;  %v1006_v50 = vpack.c.bf16 %v280_v40, %v279_v39  ;;  %v1008_v52 = vpack.c.bf16 %v298_v45, %v297_v44 }
  0x29   : > { %995 = vmatpush3.bf16.msra.mxu1 %v994_v13  ;;  %965 = vmatprep.subr.bf16.mxu0 %v964_v14  ;;  %v207_v48 = vld [vmem:[%s1443_s29] sm:$0xff]  ;;  %v209_v49 = vld [vmem:[%s1443_s29 + $0x10] sm:$0xff]  ;;  %v1038_v51 = vpack.c.bf16 %v312_v43, %v311_v41  ;;  %v282_v54 = vld [vmem:[%s1774_s1 + $0x218] sm:$0xff]  ;;  %v1040_v56 = vpack.c.bf16 %v330_v47, %v329_v46 }
  0x2a   : > { %997 = vmatprep.subr.bf16.mxu1 %v996_v18  ;;  %v281_v53 = vld [vmem:[%s1774_s1 + $0x210] sm:$0xff]  ;;  %v314_v57 = vld [vmem:[%s1774_s1 + $0x318] sm:$0xff]  ;;  %v299_v58 = vld [vmem:[%s1774_s1 + $0x2a0] sm:$0xff] }
  0x2b   : > { %v313_v55 = vld [vmem:[%s1774_s1 + $0x310] sm:$0xff]  ;;  %v300_v59 = vld [vmem:[%s1774_s1 + $0x2a8] sm:$0xff]  ;;  %v331_v60 = vld [vmem:[%s1774_s1 + $0x3a0] sm:$0xff]  ;;  %v1010_v62 = vpack.c.bf16 %v282_v54, %v281_v53 }
  0x2c   : > { %967 = vmatpush3.bf16.msra.mxu0 %v966_v24  ;;  %v332_v61 = vld [vmem:[%s1774_s1 + $0x3a8] sm:$0xff]  ;;  %v1042_v63 = vpack.c.bf16 %v314_v57, %v313_v55  ;;  %v1012_v0 = vpack.c.bf16 %v300_v59, %v299_v58  ;;  %v283_v1 = vld [vmem:[%s1774_s1 + $0x220] sm:$0xff]  ;;  %v301_v6 = vld [vmem:[%s1774_s1 + $0x2b0] sm:$0xff] }
  0x2d   : > { %999 = vmatpush3.bf16.msra.mxu1 %v998_v25  ;;  %969 = vmatprep.subr.bf16.mxu0 %v968_v26  ;;  %v284_v2 = vld [vmem:[%s1774_s1 + $0x228] sm:$0xff]  ;;  %v315_v3 = vld [vmem:[%s1774_s1 + $0x320] sm:$0xff]  ;;  %v1044_v4 = vpack.c.bf16 %v332_v61, %v331_v60  ;;  %v302_v7 = vld [vmem:[%s1774_s1 + $0x2b8] sm:$0xff] }
  0x2e   : > { %1001 = vmatprep.subr.bf16.mxu1 %v1000_v30  ;;  %v316_v5 = vld [vmem:[%s1774_s1 + $0x328] sm:$0xff]  ;;  %v333_v8 = vld [vmem:[%s1774_s1 + $0x3b0] sm:$0xff]  ;;  %v334_v9 = vld [vmem:[%s1774_s1 + $0x3b8] sm:$0xff]  ;;  %v1014_v10 = vpack.c.bf16 %v284_v2, %v283_v1  ;;  %v1016_v12 = vpack.c.bf16 %v302_v7, %v301_v6 }
  0x2f   : > { %v1046_v11 = vpack.c.bf16 %v316_v5, %v315_v3  ;;  %v285_v13 = vld [vmem:[%s1774_s1 + $0x230] sm:$0xff]  ;;  %v286_v14 = vld [vmem:[%s1774_s1 + $0x238] sm:$0xff]  ;;  %v1048_v16 = vpack.c.bf16 %v334_v9, %v333_v8  ;;  %v303_v18 = vld [vmem:[%s1774_s1 + $0x2c0] sm:$0xff] }
  0x30   : > { %971 = vmatpush3.bf16.msra.mxu0 %v970_v36  ;;  %v317_v15 = vld [vmem:[%s1774_s1 + $0x330] sm:$0xff]  ;;  %v318_v17 = vld [vmem:[%s1774_s1 + $0x338] sm:$0xff]  ;;  %v304_v19 = vld [vmem:[%s1774_s1 + $0x2c8] sm:$0xff]  ;;  %v1018_v22 = vpack.c.bf16 %v286_v14, %v285_v13 }
  0x31   : > { %1003 = vmatpush3.bf16.msra.mxu1 %v1002_v37  ;;  %1005 = vmatprep.subr.bf16.mxu0 %v1004_v38  ;;  %v335_v20 = vld [vmem:[%s1774_s1 + $0x3c0] sm:$0xff]  ;;  %v336_v21 = vld [vmem:[%s1774_s1 + $0x3c8] sm:$0xff]  ;;  %v214_v24 = vld [vmem:[%s1443_s29 + $0x38] sm:$0xff]  ;;  %v1050_v25 = vpack.c.bf16 %v318_v17, %v317_v15  ;;  %v1020_v26 = vpack.c.bf16 %v304_v19, %v303_v18  ;;  %v634_v15 = vlaneseq  ;;  %v636_v17 = vstv %s792_s22 }
  0x32   : > { %1037 = vmatprep.subr.bf16.mxu1 %v1036_v42  ;;  %v212_v23 = vld [vmem:[%s1443_s29 + $0x28] sm:$0xff]  ;;  %v287_v27 = vld [vmem:[%s1774_s1 + $0x240] sm:$0xff]  ;;  %v1052_v30 = vpack.c.bf16 %v336_v21, %v335_v20  ;;  %v305_v32 = vld [vmem:[%s1774_s1 + $0x2d0] sm:$0xff] }
  0x33   : > { %408 = vmatmul.mubr.f32.vlgmr.msra.gmra.mrb[0].mxu0 %v207_v48  ;;  %v288_v28 = vld [vmem:[%s1774_s1 + $0x248] sm:$0xff]  ;;  %v319_v29 = vld [vmem:[%s1774_s1 + $0x340] sm:$0xff]  ;;  %v306_v33 = vld [vmem:[%s1774_s1 + $0x2d8] sm:$0xff] }
  0x34   : > { %478 = vmatmul.mubr.f32.vlgmr.msra.gmra.mrb[0].mxu1 %v209_v49  ;;  %1007 = vmatpush3.bf16.msra.mxu0 %v1006_v50  ;;  %v320_v31 = vld [vmem:[%s1774_s1 + $0x348] sm:$0xff]  ;;  %v337_v34 = vld [vmem:[%s1774_s1 + $0x3d0] sm:$0xff]  ;;  %v338_v35 = vld [vmem:[%s1774_s1 + $0x3d8] sm:$0xff]  ;;  %v1022_v36 = vpack.c.bf16 %v288_v28, %v287_v27  ;;  %v1024_v38 = vpack.c.bf16 %v306_v33, %v305_v32 }
  0x35   : > { %1039 = vmatpush3.bf16.msra.mxu1 %v1038_v51  ;;  %1009 = vmatprep.subr.bf16.mxu0 %v1008_v52  ;;  %v1054_v37 = vpack.c.bf16 %v320_v31, %v319_v29  ;;  %v289_v39 = vld [vmem:[%s1774_s1 + $0x250] sm:$0xff]  ;;  %v290_v40 = vld [vmem:[%s1774_s1 + $0x258] sm:$0xff]  ;;  %v1056_v42 = vpack.c.bf16 %v338_v35, %v337_v34  ;;  %v307_v44 = vld [vmem:[%s1774_s1 + $0x2e0] sm:$0xff] }
  0x36   : > { %1041 = vmatprep.subr.bf16.mxu1 %v1040_v56  ;;  %547 = vmatprep.mubr.f32.mxu0 %v212_v23  ;;  %v321_v41 = vld [vmem:[%s1774_s1 + $0x350] sm:$0xff]  ;;  %v322_v43 = vld [vmem:[%s1774_s1 + $0x358] sm:$0xff]  ;;  %v308_v45 = vld [vmem:[%s1774_s1 + $0x2e8] sm:$0xff]  ;;  %v1026_v48 = vpack.c.bf16 %v290_v40, %v289_v39 }
  0x37   : > { %617 = vmatprep.mubr.f32.mxu1 %v214_v24  ;;  %v339_v46 = vld [vmem:[%s1774_s1 + $0x3e0] sm:$0xff]  ;;  %v340_v47 = vld [vmem:[%s1774_s1 + $0x3e8] sm:$0xff]  ;;  %v1058_v49 = vpack.c.bf16 %v322_v43, %v321_v41  ;;  %v1028_v50 = vpack.c.bf16 %v308_v45, %v307_v44  ;;  %v309_v56 = vld [vmem:[%s1774_s1 + $0x2f0] sm:$0xff] }
  0x38   : > { %1011 = vmatpush3.bf16.msra.mxu0 %v1010_v62  ;;  %v291_v51 = vld [vmem:[%s1774_s1 + $0x260] sm:$0xff]  ;;  %v292_v52 = vld [vmem:[%s1774_s1 + $0x268] sm:$0xff]  ;;  %v1060_v54 = vpack.c.bf16 %v340_v47, %v339_v46  ;;  %v310_v57 = vld [vmem:[%s1774_s1 + $0x2f8] sm:$0xff] }
  0x39   : > { %1043 = vmatpush3.bf16.msra.mxu1 %v1042_v63  ;;  %1013 = vmatprep.subr.bf16.mxu0 %v1012_v0  ;;  %v323_v53 = vld [vmem:[%s1774_s1 + $0x360] sm:$0xff]  ;;  %v324_v55 = vld [vmem:[%s1774_s1 + $0x368] sm:$0xff]  ;;  %v341_v58 = vld [vmem:[%s1774_s1 + $0x3f0] sm:$0xff]  ;;  %v1030_v60 = vpack.c.bf16 %v292_v52, %v291_v51  ;;  %v1032_v62 = vpack.c.bf16 %v310_v57, %v309_v56 }
  0x3a   : > { %1045 = vmatprep.subr.bf16.mxu1 %v1044_v4  ;;  %v342_v59 = vld [vmem:[%s1774_s1 + $0x3f8] sm:$0xff]  ;;  %v1062_v61 = vpack.c.bf16 %v324_v55, %v323_v53  ;;  %v293_v63 = vld [vmem:[%s1774_s1 + $0x270] sm:$0xff]  ;;  %v211_v6 = vld [vmem:[%s1443_s29 + $0x20] sm:$0xff] }
  0x3b   : > { %v294_v0 = vld [vmem:[%s1774_s1 + $0x278] sm:$0xff]  ;;  %v1064_v1 = vpack.c.bf16 %v342_v59, %v341_v58  ;;  %v325_v2 = vld [vmem:[%s1774_s1 + $0x370] sm:$0xff] }
  0x3c   : > { %1015 = vmatpush3.bf16.msra.mxu0 %v1014_v10  ;;  %v326_v3 = vld [vmem:[%s1774_s1 + $0x378] sm:$0xff]  ;;  %v1034_v4 = vpack.c.bf16 %v294_v0, %v293_v63  ;;  %v213_v7 = vld [vmem:[%s1443_s29 + $0x30] sm:$0xff]  ;;  %s787_s29 = sshll.u32 %s1689_s23, 3 }
  0x3d   : > { %1047 = vmatpush3.bf16.msra.mxu1 %v1046_v11  ;;  %1017 = vmatprep.subr.bf16.mxu0 %v1016_v12  ;;  %v1066_v5 = vpack.c.bf16 %v326_v3, %v325_v2  ;;  %s194_s7 = scalar_lea.vmem [#allocation2], %s787_s29 }
  0x3e   : > { %1049 = vmatprep.subr.bf16.mxu1 %v1048_v16  ;;  %v635_v16 = vshrl.u32 %v634_v15, 7  ;;  %s679_s8 = sshll.u32 %s194_s7, 4  ;;  %s1701_s8 = int_to_ptr.vmem [resolvable:$true] %s679_s8 }
  0x3f   : > { %s1112_s5 = scalar_lea.vmem %s1701_s8, 128  ;;  %p1119_p0 = scmp.lt.s32.totalorder %s1701_s8, %s1117_s13 }
  0x40   : > { %1019 = vmatpush3.bf16.msra.mxu0 %v1018_v22  ;;  %v637_v21 = vadd.s32 %v636_v17, %v635_v16  ;;  %p1113_p11 = scmp.ne.s32.totalorder %s1701_s8, %s1112_s5  ;;  %p1120_p1 = scmp.lt.s32.totalorder %s1118_s14, %s1112_s5 }
  0x41   : > { %1051 = vmatpush3.bf16.msra.mxu1 %v1050_v25  ;;  %1021 = vmatprep.subr.bf16.mxu0 %v1020_v26  ;;  %v791_v26 = vld [vmem:[%s1775_s2] ss:$0 sm:$0xff] }
  0x42   : > { %1053 = vmatprep.subr.bf16.mxu1 %v1052_v30  ;;  %vm638_vm0 = vcmp.lt.s32.totalorder %v637_v21, 16  ;;  %p1114_p12 = pnand %p1113_p11, %p1273_p5  ;;  %p1121_p2 = por %p1120_p1, %p1119_p0 }
  0x44   : > { %1023 = vmatpush3.bf16.msra.mxu0 %v1022_v36  ;;  %p1115_p13 = pneg %p1114_p12 }
  0x45   : > { %1055 = vmatpush3.bf16.msra.mxu1 %v1054_v37  ;;  %1025 = vmatprep.subr.bf16.mxu0 %v1024_v38 }
  0x46   : > { %1057 = vmatprep.subr.bf16.mxu1 %v1056_v42  ;;  %p1122_p3 = pnand %p1121_p2, %p1115_p13 }
  0x48   : > { %1027 = vmatpush3.bf16.msra.mxu0 %v1026_v48 }
  0x49   : > { %1059 = vmatpush3.bf16.msra.mxu1 %v1058_v49  ;;  %1029 = vmatprep.subr.bf16.mxu0 %v1028_v50 }
  0x4a   : > { %1061 = vmatprep.subr.bf16.mxu1 %v1060_v54 }
  0x4c   : > { %1031 = vmatpush3.bf16.msra.mxu0 %v1030_v60 }
  0x4d   : > { %1063 = vmatpush3.bf16.msra.mxu1 %v1062_v61  ;;  %1033 = vmatprep.subr.bf16.mxu0 %v1032_v62 }
  0x4e   : > { %1065 = vmatprep.subr.bf16.mxu1 %v1064_v1 }
  0x50   : > { %1035 = vmatpush3.bf16.msra.mxu0 %v1034_v4 }
  0x51   : > { %1067 = vmatpush3.bf16.msra.mxu1 %v1066_v5 }
  0x53   : > { %548 = vmatmul.mubr.f32.vlgmr.msra.gmra.mrb[2].mxu0 %v211_v6 }
  0x54   : > { %618 = vmatmul.mubr.f32.vlgmr.msra.gmra.mrb[2].mxu1 %v213_v7 }
 0x106   : > { %v832_v8 = vpop.f32.mrb[0].mxu0 }
 0x107   : > { %v867_v9 = vpop.f32.mrb[0].mxu1  ;;  %v833_v10 = vpop.f32.mrb[1].mxu0 }
 0x108   : > { %v834_v11 = vadd.f32 %v833_v10, %v832_v8  ;;  %v868_v12 = vpop.f32.mrb[1].mxu1 }
 0x109   : > { %v869_v13 = vadd.f32 %v868_v12, %v867_v9 }
 0x10b   : > { %v480_v14 = vadd.f32 %v869_v13, %v834_v11 }
 0x126   : > { %v902_v18 = vpop.f32.mrb[2].mxu0 }
 0x127   : > { %v903_v19 = vpop.f32.mrb[3].mxu0  ;;  %v937_v20 = vpop.f32.mrb[2].mxu1 }
 0x128   : > { %v904_v22 = vadd.f32 %v903_v19, %v902_v18  ;;  %v938_v23 = vpop.f32.mrb[3].mxu1 }
 0x129   : > { %v939_v24 = vadd.f32 %v938_v23, %v937_v20 }
 0x12a   : > { %v550_v25 = vadd.f32 %v904_v22, %v480_v14 }
 0x12c   : > { %v620_v27 = vadd.f32 %v939_v24, %v550_v25 }
 0x12e   : > { %v630_v28 = vadd.f32 %v791_v26, %v620_v27  ;;  %v641_v29 = vsel %vm638_vm0, %v620_v27, 0.0 }
 0x12f   : > { %v642_v30 = vsel %vm631_vm1, %v641_v29, 0.0  ;;  %v651_v31 = vmul.f32 %v641_v29, %v641_v29 }
 0x130   : > { %v643_v32 = vrot.slane %v642_v30, 4  ;;  %632 = vst.msk [vmem:[%s194_s7] sm:$0xff] %vm631_vm1, %v630_v28 }
 0x131   : > { %v652_v33 = vsel %vm631_vm1, %v651_v31, 0.0 }
 0x132   : > { %1125 = shalt.err (!%p1122_p3)
}
 0x133   : > { %s1126_s20 = scalar_lea.hbm %s1699_s11, 128  ;;  %s1130_s27 = scalar_lea.hbm %s1776_s3, 256 }
 0x134   : > { %p1127_p4 = scmp.ne.s32.totalorder %s1699_s11, %s1126_s20  ;;  %p1131_p9 = scmp.lt.u32.totalorder %s1699_s11, %s1776_s3 }
 0x135   : > { %p1132_p10 = scmp.lt.u32.totalorder %s1130_s27, %s1126_s20  ;;  %p1134_p12 = scmp.lt.u32.totalorder %s1126_s20, %s1699_s11 }
 0x136   : > { %p1128_p7 = pnand %p1127_p4, %p1273_p5 }
 0x137   : > { %p1133_p11 = por %p1132_p10, %p1131_p9 }
 0x138   : > { %p1129_p8 = pneg %p1128_p7 }
 0x139   : > { %p1135_p13 = por %p1134_p12, %p1133_p11 }
 0x13b   : > { %p1136_p0 = pnand %p1135_p13, %p1129_p8 }
 0x13d   : > { %1139 = shalt.err (!%p1136_p0)
}
 0x13e   : > { %1068 = dma.vmem_to_hbm [thread:$0]  (%p1273_p5), %s1701_s8, 128, %s1699_s11, %s661_s12   ;;  %v644_v34 = vadd.f32 %v643_v32, %v642_v30  ;;  %v653_v35 = vrot.slane %v652_v33, 4  ;;  %vm649_vm2 = vcmask 253952  }
 0x13f   : > { %s788_s7 = sshll.u32 %s1689_s23, 1  ;;  %s796_s9 = sshll.u32 %s1256_s19, 5 }
 0x140   : > { %v645_v36 = vrot.slane %v644_v34, 2  ;;  %v654_v37 = vadd.f32 %v653_v35, %v652_v33  ;;  %s201_s10 = scalar_lea.vmem [#allocation4], %s788_s7  ;;  %s1730_s12 = scalar_lea.hbm %s1777_s4, %s796_s9 }
 0x141   : > { %s692_s5 = sshll.u32 %s201_s10, 4  ;;  %s666_s6 = scalar_lea.sflag [#allocation5], %s1689_s23  ;;  %s1732_s5 = int_to_ptr.vmem [resolvable:$true] %s692_s5 }
 0x142   : > { %v646_v38 = vadd.f32 %v645_v36, %v644_v34  ;;  %v655_v39 = vrot.slane %v654_v37, 2  ;;  %s1140_s13 = scalar_lea.vmem %s1732_s5, 32  ;;  %s1209_s19 = smov [#allocation4]  }
 0x143   : > { %p1141_p1 = scmp.ne.s32.totalorder %s1732_s5, %s1140_s13  ;;  %s1144_s14 = sshll.u32 %s1209_s19, 4  ;;  %s1145_s14 = int_to_ptr.vmem [resolvable:$false] %s1144_s14 }
 0x144   : > { %v647_v40 = vrot.slane %v646_v38, 1  ;;  %v656_v41 = vadd.f32 %v655_v39, %v654_v37  ;;  %s1146_s20 = scalar_lea.vmem %s1145_s14, 64  ;;  %p1147_p4 = scmp.lt.s32.totalorder %s1732_s5, %s1145_s14 }
 0x145   : > { %p1142_p2 = pnand %p1141_p1, %p1273_p5  ;;  %p1148_p7 = scmp.lt.s32.totalorder %s1146_s20, %s1140_s13 }
 0x146   : > { %v648_v42 = vadd.f32 %v647_v40, %v646_v38  ;;  %v657_v43 = vrot.slane %v656_v41, 1 }
 0x147   : > { %p1143_p3 = pneg %p1142_p2  ;;  %p1149_p8 = por %p1148_p7, %p1147_p4 }
 0x148   : > { %650 = vst.msk [vmem:[%s201_s10] sm:$0x1] %vm649_vm2, %v648_v42  ;;  %v658_v44 = vadd.f32 %v657_v43, %v656_v41 }
 0x149   : > { %p1150_p9 = pnand %p1149_p8, %p1143_p3 }
 0x14a   : > { %659 = vst.msk [vmem:[%s201_s10 + $0x1] sm:$0x1] %vm649_vm2, %v658_v44 }
 0x14b   : > { %1153 = shalt.err (!%p1150_p9)
}
 0x14c   : > { %s1154_s23 = scalar_lea.hbm %s1730_s12, 32  ;;  %s1158_s27 = scalar_lea.hbm %s1777_s4, 64 }
 0x14d   : > { %p1155_p10 = scmp.ne.s32.totalorder %s1730_s12, %s1154_s23  ;;  %p1159_p13 = scmp.lt.u32.totalorder %s1730_s12, %s1777_s4 }
 0x14e   : > { %p1160_p0 = scmp.lt.u32.totalorder %s1158_s27, %s1154_s23  ;;  %p1162_p2 = scmp.lt.u32.totalorder %s1154_s23, %s1730_s12 }
 0x14f   : > { %p1156_p11 = pnand %p1155_p10, %p1273_p5 }
 0x150   : > { %p1161_p1 = por %p1160_p0, %p1159_p13 }
 0x151   : > { %p1157_p12 = pneg %p1156_p11 }
 0x152   : > { %p1163_p3 = por %p1162_p2, %p1161_p1 }
 0x154   : > { %p1164_p4 = pnand %p1163_p3, %p1157_p12 }
 0x156   : > { %1167 = shalt.err (!%p1164_p4)
}
 0x157   : > { %1069 = dma.vmem_to_hbm [thread:$0]  (%p1273_p5), %s1732_s5, 32, %s1730_s12, %s666_s6  }
 0x158 PF: > { %p1079_p7 = scmp.ge.s32.totalorder %s1206_s18, 2  ;;  %s704_s7 = sand.u32 1, %s1194_s15  }
 0x159   : > { %s705_s9 = scalar_lea.sflag [#allocation3], %s704_s7 }
 0x15a   : > { %p1073_p8 = pnand %p1079_p7, %p1277_p6 }
 0x15c   : > { %1185 = dma.done.wait (!%p1073_p8), %s705_s9, 128  }
 0x15d   : > { %1187 = vsyncadd (!%p1073_p8), %s705_s9, 4294967168  ;;  %s714_s10 = scalar_lea.sflag [#allocation5], %s704_s7 }
 0x15e   : > { %1189 = dma.done.wait (!%p1073_p8), %s714_s10, 32  }
 0x15f   : > { %1191 = vsyncadd (!%p1073_p8), %s714_s10, 4294967264  ;;  %p18_p5 = scmp.ge.s32.totalorder %s1260_s21, 4   ;;  %s1780_s15 = smov %s1198_s16 }
 0x160   : > { %s1781_s16 = smov %s1202_s17  ;;  %s1782_s17 = smov %s1271_s24 }
 0x161   : > { %s1783_s18 = smov %s1260_s21  ;;  %20 = sbr.rel (!%p18_p5) target bundleno = 5 (0x5), region = 84 }
 0x168   :  { %719 = vsyncpa [#allocation3], 1 }
 0x169   :  { %721 = vsyncpa [#allocation3 + $0x1], 1 }
 0x16a   :  { %722 = vsyncpa [#allocation5], 1 }
 0x16b   :  { %724 = vsyncpa [#allocation5 + $0x1], 1 }

</bundles_post_ra>
